<compile_context>
chip_gen: v6e
topology: v6e:2x2x1
jax: 0.10.0
libtpu: 0.0.40
codegen_flags: <defaults>
</compile_context>

<pallas_src>
import jax
import jax.numpy as jnp
from jax.experimental import pallas as pl
from jax.experimental.pallas import tpu as pltpu


def _disc_kernel(u_ref, h1_ref, h2_ref, h3_ref, h4_ref,
                 o1_ref, o2_ref, o3_ref, o4_ref):
    # u_ref:  (2, D)  -- u[0] = W @ c1, u[1] = W @ c2 (VMEM resident)
    # hK_ref: (TR, D) row tiles of the four hidden matrices
    # oK_ref: (TR, 1) per-pair scores (bias added in the wrapper)
    u1 = u_ref[0:1, :].astype(jnp.float32)   # (1, D), broadcasts over rows
    u2 = u_ref[1:2, :].astype(jnp.float32)
    h1 = h1_ref[...].astype(jnp.float32)
    h2 = h2_ref[...].astype(jnp.float32)
    h3 = h3_ref[...].astype(jnp.float32)
    h4 = h4_ref[...].astype(jnp.float32)
    # VPU elementwise multiply + XLU lane reduction; no MXU needed.
    o1_ref[...] = jnp.sum(h2 * u1, axis=-1, keepdims=True).astype(o1_ref.dtype)
    o2_ref[...] = jnp.sum(h1 * u2, axis=-1, keepdims=True).astype(o2_ref.dtype)
    o3_ref[...] = jnp.sum(h4 * u1, axis=-1, keepdims=True).astype(o3_ref.dtype)
    o4_ref[...] = jnp.sum(h3 * u2, axis=-1, keepdims=True).astype(o4_ref.dtype)


def _round_up(x, m):
    return ((x + m - 1) // m) * m


def _pick_row_tile(n, d, itemsize):
    # Budget ~12 MiB for the four double-buffered h tiles -> safe under the
    # scoped-VMEM defaults of v5e (16 MiB) / v6e (32 MiB) / v7x (32 MiB),
    # while still giving >=512-row tiles for D <= ~768 (amortizes per-step
    # pipeline overhead and reaches ~85% of HBM roofline).
    budget = 12 * 1024 * 1024
    per_row = 4 * 2 * d * itemsize          # 4 h streams x 2 buffers x row bytes
    tr = max(8, min(2048, budget // per_row))
    tr = (tr // 8) * 8                      # sublane alignment
    return min(_round_up(n, 8), tr)


def _disc_scores(u, h1, h2, h3, h4):
    """u: (2, D); h1..h4: (N, D)  ->  four (N, 1) f32 score columns."""
    N, D = h1.shape
    TR = _pick_row_tile(N, D, jnp.dtype(h1.dtype).itemsize)
    grid = (pl.cdiv(N, TR),)

    h_spec = pl.BlockSpec((TR, D), lambda i: (i, 0))
    o_spec = pl.BlockSpec((TR, 1), lambda i: (i, 0))
    o_shape = jax.ShapeDtypeStruct((N, 1), jnp.float32)

    return pl.pallas_call(
        _disc_kernel,
        out_shape=(o_shape, o_shape, o_shape, o_shape),
        grid_spec=pltpu.PrefetchScalarGridSpec(
            num_scalar_prefetch=0,
            grid=grid,
            in_specs=[
                pl.BlockSpec((2, D), lambda i: (0, 0)),   # u stays VMEM-resident
                h_spec, h_spec, h_spec, h_spec,
            ],
            out_specs=[o_spec, o_spec, o_spec, o_spec],
        ),
        compiler_params=pltpu.CompilerParams(
            dimension_semantics=("parallel",)),           # megacore on v7x
    )(u, h1, h2, h3, h4)


def discriminator_forward(c1, c2, h1, h2, h3, h4, W, b):
    """JAX wrapper mirroring Discriminator.forward.

    c1, c2: (1, D); h1..h4: (N, D); W: (D, D) (== nn.Bilinear weight[0]); b scalar.
    Returns logits of shape (4N,) in the torch.cat((sc_1, sc_2, sc_3, sc_4)) order.
    """
    # Fold the bilinear weight into the two context vectors (rank-2 structure):
    #   score(h, c_k) = h . (W @ c_k) + b ,  u_k = c_k @ W.T
    cs = jnp.concatenate([c1, c2], axis=0).astype(jnp.float32)     # (2, D)
    u = jnp.dot(cs, W.astype(jnp.float32).T,
                preferred_element_type=jnp.float32)                 # (2, D)

    s1, s2, s3, s4 = _disc_scores(u, h1, h2, h3, h4)                # 4 x (N, 1)

    logits = jnp.concatenate([s1, s2, s3, s4], axis=0).reshape(-1)  # (4N,)
    return logits + jnp.asarray(b, jnp.float32)


if __name__ == "__main__":
    key = jax.random.PRNGKey(0)
    N, D = 8, 32

    k = jax.random.split(key, 8)
    c1 = jax.random.normal(k[0], (1, D), dtype=jnp.float32)
    c2 = jax.random.normal(k[1], (1, D), dtype=jnp.float32)
    h1 = jax.random.normal(k[2], (N, D), dtype=jnp.float32)
    h2 = jax.random.normal(k[3], (N, D), dtype=jnp.float32)
    h3 = jax.random.normal(k[4], (N, D), dtype=jnp.float32)
    h4 = jax.random.normal(k[5], (N, D), dtype=jnp.float32)

    # Deterministic init of nn.Bilinear(dim, dim, 1) params:
    # weight shape (1, D, D) -> W = weight[0]; bias shape (1,) -> scalar b.
    bound = 1.0 / jnp.sqrt(jnp.float32(D))
    W = jax.random.uniform(k[6], (D, D), dtype=jnp.float32, minval=-bound, maxval=bound)
    b = jax.random.uniform(k[7], (), dtype=jnp.float32, minval=-bound, maxval=bound)

    fwd = jax.jit(discriminator_forward)
    logits = jax.block_until_ready(fwd(c1, c2, h1, h2, h3, h4, W, b))

    # Pure-JAX reference of the bilinear form (same as torch semantics).
    def ref_bil(h, c):
        return jnp.einsum("ni,ij,nj->n", h, W, c) + b

    ref = jnp.concatenate([
        ref_bil(h2, jnp.broadcast_to(c1, (N, D))),
        ref_bil(h1, jnp.broadcast_to(c2, (N, D))),
        ref_bil(h4, jnp.broadcast_to(c1, (N, D))),
        ref_bil(h3, jnp.broadcast_to(c2, (N, D))),
    ])

    assert logits.shape == (4 * N,)
    assert jnp.allclose(logits, ref, atol=1e-4, rtol=1e-4)

    print("KERNEL_OK")
</pallas_src>

<mosaic_0001>
module attributes {stable_mosaic.version = 11 : i64} {
  func.func @_disc_kernel(%arg0: i32, %arg1: memref<2x32xf32, #tpu.memory_space<vmem>>, %arg2: memref<8x32xf32, #tpu.memory_space<vmem>>, %arg3: memref<8x32xf32, #tpu.memory_space<vmem>>, %arg4: memref<8x32xf32, #tpu.memory_space<vmem>>, %arg5: memref<8x32xf32, #tpu.memory_space<vmem>>, %arg6: memref<8x1xf32, #tpu.memory_space<vmem>>, %arg7: memref<8x1xf32, #tpu.memory_space<vmem>>, %arg8: memref<8x1xf32, #tpu.memory_space<vmem>>, %arg9: memref<8x1xf32, #tpu.memory_space<vmem>>) attributes {dimension_semantics = [#tpu.dimension_semantics<parallel>], iteration_bounds = array<i64: 1>, scalar_prefetch = 0 : i64, scratch_operands = 0 : i64, tpu.core_type = #tpu.core_type<tc>, window_params = [{pipeline_mode = #tpu.pipeline_mode<synchronous>, transform_indices = @transform_0, window_bounds = array<i64: 2, 32>}, {transform_indices = @transform_1, window_bounds = array<i64: 8, 32>}, {transform_indices = @transform_2, window_bounds = array<i64: 8, 32>}, {transform_indices = @transform_3, window_bounds = array<i64: 8, 32>}, {transform_indices = @transform_4, window_bounds = array<i64: 8, 32>}, {transform_indices = @transform_5, window_bounds = array<i64: 8, 1>}, {transform_indices = @transform_6, window_bounds = array<i64: 8, 1>}, {transform_indices = @transform_7, window_bounds = array<i64: 8, 1>}, {transform_indices = @transform_8, window_bounds = array<i64: 8, 1>}]} {
    %c0 = arith.constant 0 : index
    %c0_0 = arith.constant 0 : index
    %0 = vector.load %arg1[%c0, %c0_0] : memref<2x32xf32, #tpu.memory_space<vmem>>, vector<1x32xf32>
    %c1 = arith.constant 1 : index
    %c0_1 = arith.constant 0 : index
    %1 = vector.load %arg1[%c1, %c0_1] : memref<2x32xf32, #tpu.memory_space<vmem>>, vector<1x32xf32>
    %c0_2 = arith.constant 0 : index
    %c0_3 = arith.constant 0 : index
    %2 = vector.load %arg2[%c0_2, %c0_3] : memref<8x32xf32, #tpu.memory_space<vmem>>, vector<8x32xf32>
    %c0_4 = arith.constant 0 : index
    %c0_5 = arith.constant 0 : index
    %3 = vector.load %arg3[%c0_4, %c0_5] : memref<8x32xf32, #tpu.memory_space<vmem>>, vector<8x32xf32>
    %c0_6 = arith.constant 0 : index
    %c0_7 = arith.constant 0 : index
    %4 = vector.load %arg4[%c0_6, %c0_7] : memref<8x32xf32, #tpu.memory_space<vmem>>, vector<8x32xf32>
    %c0_8 = arith.constant 0 : index
    %c0_9 = arith.constant 0 : index
    %5 = vector.load %arg5[%c0_8, %c0_9] : memref<8x32xf32, #tpu.memory_space<vmem>>, vector<8x32xf32>
    %6 = vector.broadcast %0 : vector<1x32xf32> to vector<8x32xf32>
    %7 = arith.mulf %3, %6 : vector<8x32xf32>
    %cst = arith.constant dense<0.000000e+00> : vector<8xf32>
    %8 = vector.multi_reduction <add>, %7, %cst [1] : vector<8x32xf32> to vector<8xf32>
    %9 = vector.shape_cast %8 : vector<8xf32> to vector<8x1xf32>
    %c0_10 = arith.constant 0 : index
    %c0_11 = arith.constant 0 : index
    %10 = vector.load %arg6[%c0_10, %c0_11] : memref<8x1xf32, #tpu.memory_space<vmem>>, vector<8x1xf32>
    tpu.vector_store %arg6[%c0_10, %c0_11], %9 {strides = array<i32>} : memref<8x1xf32, #tpu.memory_space<vmem>>, vector<8x1xf32>,
    %11 = vector.broadcast %1 : vector<1x32xf32> to vector<8x32xf32>
    %12 = arith.mulf %2, %11 : vector<8x32xf32>
    %cst_12 = arith.constant dense<0.000000e+00> : vector<8xf32>
    %13 = vector.multi_reduction <add>, %12, %cst_12 [1] : vector<8x32xf32> to vector<8xf32>
    %14 = vector.shape_cast %13 : vector<8xf32> to vector<8x1xf32>
    %c0_13 = arith.constant 0 : index
    %c0_14 = arith.constant 0 : index
    %15 = vector.load %arg7[%c0_13, %c0_14] : memref<8x1xf32, #tpu.memory_space<vmem>>, vector<8x1xf32>
    tpu.vector_store %arg7[%c0_13, %c0_14], %14 {strides = array<i32>} : memref<8x1xf32, #tpu.memory_space<vmem>>, vector<8x1xf32>,
    %16 = vector.broadcast %0 : vector<1x32xf32> to vector<8x32xf32>
    %17 = arith.mulf %5, %16 : vector<8x32xf32>
    %cst_15 = arith.constant dense<0.000000e+00> : vector<8xf32>
    %18 = vector.multi_reduction <add>, %17, %cst_15 [1] : vector<8x32xf32> to vector<8xf32>
    %19 = vector.shape_cast %18 : vector<8xf32> to vector<8x1xf32>
    %c0_16 = arith.constant 0 : index
    %c0_17 = arith.constant 0 : index
    %20 = vector.load %arg8[%c0_16, %c0_17] : memref<8x1xf32, #tpu.memory_space<vmem>>, vector<8x1xf32>
    tpu.vector_store %arg8[%c0_16, %c0_17], %19 {strides = array<i32>} : memref<8x1xf32, #tpu.memory_space<vmem>>, vector<8x1xf32>,
    %21 = vector.broadcast %1 : vector<1x32xf32> to vector<8x32xf32>
    %22 = arith.mulf %4, %21 : vector<8x32xf32>
    %cst_18 = arith.constant dense<0.000000e+00> : vector<8xf32>
    %23 = vector.multi_reduction <add>, %22, %cst_18 [1] : vector<8x32xf32> to vector<8xf32>
    %24 = vector.shape_cast %23 : vector<8xf32> to vector<8x1xf32>
    %c0_19 = arith.constant 0 : index
    %c0_20 = arith.constant 0 : index
    %25 = vector.load %arg9[%c0_19, %c0_20] : memref<8x1xf32, #tpu.memory_space<vmem>>, vector<8x1xf32>
    tpu.vector_store %arg9[%c0_19, %c0_20], %24 {strides = array<i32>} : memref<8x1xf32, #tpu.memory_space<vmem>>, vector<8x1xf32>,
    return
  }
  func.func @transform_0(%arg0: i32) -> (i32, i32) {
    %c0_i32 = arith.constant 0 : i32
    %c0_i32_0 = arith.constant 0 : i32
    %c0_i32_1 = arith.constant 0 : i32
    return %c0_i32, %c0_i32_0 : i32, i32
  }
  func.func @transform_1(%arg0: i32) -> (i32, i32) {
    %c0_i32 = arith.constant 0 : i32
    %c0_i32_0 = arith.constant 0 : i32
    return %arg0, %c0_i32 : i32, i32
  }
  func.func @transform_2(%arg0: i32) -> (i32, i32) {
    %c0_i32 = arith.constant 0 : i32
    %c0_i32_0 = arith.constant 0 : i32
    return %arg0, %c0_i32 : i32, i32
  }
  func.func @transform_3(%arg0: i32) -> (i32, i32) {
    %c0_i32 = arith.constant 0 : i32
    %c0_i32_0 = arith.constant 0 : i32
    return %arg0, %c0_i32 : i32, i32
  }
  func.func @transform_4(%arg0: i32) -> (i32, i32) {
    %c0_i32 = arith.constant 0 : i32
    %c0_i32_0 = arith.constant 0 : i32
    return %arg0, %c0_i32 : i32, i32
  }
  func.func @transform_5(%arg0: i32) -> (i32, i32) {
    %c0_i32 = arith.constant 0 : i32
    %c0_i32_0 = arith.constant 0 : i32
    return %arg0, %c0_i32 : i32, i32
  }
  func.func @transform_6(%arg0: i32) -> (i32, i32) {
    %c0_i32 = arith.constant 0 : i32
    %c0_i32_0 = arith.constant 0 : i32
    return %arg0, %c0_i32 : i32, i32
  }
  func.func @transform_7(%arg0: i32) -> (i32, i32) {
    %c0_i32 = arith.constant 0 : i32
    %c0_i32_0 = arith.constant 0 : i32
    return %arg0, %c0_i32 : i32, i32
  }
  func.func @transform_8(%arg0: i32) -> (i32, i32) {
    %c0_i32 = arith.constant 0 : i32
    %c0_i32_0 = arith.constant 0 : i32
    return %arg0, %c0_i32 : i32, i32
  }
}

</mosaic_0001>

<bundles_post_ra>
// kernel: discriminator_forward.1
= control target key start
LH: loop header
LB: loop body
LE: loop exit
PB: predicated region body
PF: predicated region fallthrough
CT: control target
= control target key end

     0   :  { %vm35_vm0 = vcmask 261120   ;;  %vm39_vm1 = vcmask 7168   ;;  %s153_s0 = inlined_call_operand.vmem [shape: f32[2,32], index: 0, kind: input, shape index: {}]   ;;  %s154_s4 = inlined_call_operand.vmem [shape: f32[8,32], index: 4, kind: input, shape index: {}]   ;;  %s155_s2 = inlined_call_operand.vmem [shape: f32[8,32], index: 2, kind: input, shape index: {}]   ;;  %s156_s3 = inlined_call_operand.vmem [shape: f32[8,32], index: 3, kind: input, shape index: {}]   ;;  %s157_s1 = inlined_call_operand.vmem [shape: f32[8,32], index: 1, kind: input, shape index: {}]   ;;  %s158_s7 = inlined_call_operand.vmem [shape: f32[8,1], index: 7, kind: output, shape index: {2}]   ;;  %s159_s5 = inlined_call_operand.vmem [shape: f32[8,1], index: 5, kind: output, shape index: {0}]   ;;  %s160_s8 = inlined_call_operand.vmem [shape: f32[8,1], index: 8, kind: output, shape index: {3}]   ;;  %s161_s6 = inlined_call_operand.vmem [shape: f32[8,1], index: 6, kind: output, shape index: {1}]  }
   0x1   :  { %v76_v0 = vld [vmem:[%s153_s0] ss:$0 sm:$0xff]  ;;  %v77_v5 = vld [vmem:[%s153_s0 + $0x1] ss:$0 sm:$0xff] }
   0x2   :  { %v29_v1 = vld [vmem:[%s154_s4] sm:$0xff] }
   0x3   :  { %v27_v2 = vld [vmem:[%s155_s2] sm:$0xff]  ;;  %v50_v3 = vmul.f32 %v76_v0, %v29_v1 }
   0x4   :  { %v34_v4 = vmul.f32 %v76_v0, %v27_v2  ;;  %v28_v6 = vld [vmem:[%s156_s3] sm:$0xff] }
   0x5   :  { %v26_v7 = vld [vmem:[%s157_s1] sm:$0xff]  ;;  %v55_v8 = vmul.f32 %v77_v5, %v28_v6  ;;  %v51_v10 = vsel %vm35_vm0, %v50_v3, 0.0 }
   0x6   :  { %v45_v9 = vmul.f32 %v77_v5, %v26_v7  ;;  %v36_v11 = vsel %vm35_vm0, %v34_v4, 0.0  ;;  %52 = vadd.xlane.f32.xlu1 %v51_v10 }
   0x7   :  { %37 = vadd.xlane.f32.xlu0 %v36_v11  ;;  %v56_v12 = vsel %vm35_vm0, %v55_v8, 0.0 }
   0x8   :  { %v46_v13 = vsel %vm35_vm0, %v45_v9, 0.0 }
   0xa   :  { %57 = vadd.xlane.f32.xlu1 %v56_v12 }
   0xb   :  { %47 = vadd.xlane.f32.xlu0 %v46_v13 }
  0x8f   :  { %v53_v14 = vpop.xlane.xlu1 %52 }
  0x90   :  { %v38_v15 = vpop.xlane.xlu0 %37  ;;  %54 = vst.msk [vmem:[%s158_s7] sm:$0xff] %vm39_vm1, %v53_v14 }
  0x91   :  { %40 = vst.msk [vmem:[%s159_s5] sm:$0xff] %vm39_vm1, %v38_v15 }
  0x93   :  { %v58_v16 = vpop.xlane.xlu1 %57 }
  0x94   :  { %v48_v17 = vpop.xlane.xlu0 %47  ;;  %59 = vst.msk [vmem:[%s160_s8] sm:$0xff] %vm39_vm1, %v58_v16 }
  0x95   :  { %49 = vst.msk [vmem:[%s161_s6] sm:$0xff] %vm39_vm1, %v48_v17 }

</bundles_post_ra>
